<compile_context>
chip_gen: v6e
topology: v6e:2x2x1
jax: 0.10.0
libtpu: 0.0.40
codegen_flags: <defaults>
</compile_context>

<pallas_src>
import jax
import jax.numpy as jnp
from jax.experimental import pallas as pl
from jax.experimental.pallas import tpu as pltpu


def _conv1x1_bn_relu6_kernel(x_ref, w_ref, b_ref, o_ref):
    # x_ref: (N, Cin, tile_hw), w_ref: (Cout, Cin), b_ref: (Cout, 1), o_ref: (N, Cout, tile_hw)
    w = w_ref[...]
    b = b_ref[...]
    # Static unroll over the (small) batch dim: each image is one lane-dense
    # (Cout, Cin) @ (Cin, tile_hw) MXU matmul + folded-BN bias + ReLU6 on the VPU.
    for n in range(x_ref.shape[0]):
        y = jnp.dot(w, x_ref[n], preferred_element_type=jnp.float32)
        y = y + b                                   # (Cout, 1) broadcast along lanes
        o_ref[n] = jnp.minimum(jnp.maximum(y, 0.0), 6.0).astype(o_ref.dtype)


def _round_up(v, m):
    return -(-v // m) * m


def _choose_tile_hw(n, cin, cout, hw, itemsize, budget_bytes):
    """Spatial tile sized from a VMEM byte budget for (x + out) per grid step.

    Accounts for 8-sublane padding of the channel dims.  Full extent if the whole
    image fits; otherwise a multiple of 512 lanes (lane-dense, unmasked stores).
    """
    per_lane = n * (_round_up(cin, 8) + _round_up(cout, 8)) * itemsize
    budget_lanes = max(512, budget_bytes // per_lane)
    if hw <= budget_lanes:
        return hw
    return max(512, (budget_lanes // 512) * 512)


def conv1x1_bn_relu6(x, w, bias, *, vmem_budget_bytes=4 << 20):
    """Fused 1x1 conv + folded (eval-mode) BN + ReLU6 for one branch.

    x:    (N, Cin, HW)   channels-first activations, H*W flattened on the lane axis
    w:    (Cout, Cin)    conv weight with the BN scale already folded in
    bias: (Cout, 1)      folded BN bias
    returns (N, Cout, HW)
    """
    N, Cin, HW = x.shape
    Cout = w.shape[0]
    dtype = x.dtype
    itemsize = jnp.dtype(dtype).itemsize

    tile_hw = _choose_tile_hw(N, Cin, Cout, HW, itemsize, vmem_budget_bytes)
    grid = (pl.cdiv(HW, tile_hw),)

    cost = pl.CostEstimate(
        flops=2 * N * HW * Cin * Cout,
        transcendentals=0,
        bytes_accessed=itemsize * (x.size + w.size + bias.size + N * Cout * HW),
    )

    # VMEM: double-buffered (x + out) tiles + tiny resident (padded) weight/bias + slack.
    tile_bytes = N * (_round_up(Cin, 8) + _round_up(Cout, 8)) * tile_hw * itemsize
    resident_bytes = (_round_up(Cout, 8) * _round_up(Cin, 128)
                      + _round_up(Cout, 8) * 128) * itemsize
    vmem_limit = int(min(max(2 * tile_bytes + 4 * resident_bytes + (2 << 20), 16 << 20),
                         32 << 20))   # <= 32 MiB keeps headroom on v7x (64 MiB VMEM/TC)

    return pl.pallas_call(
        _conv1x1_bn_relu6_kernel,
        out_shape=jax.ShapeDtypeStruct((N, Cout, HW), dtype),
        grid_spec=pltpu.PrefetchScalarGridSpec(
            num_scalar_prefetch=0,
            grid=grid,
            in_specs=[
                pl.BlockSpec((N, Cin, tile_hw), lambda s: (0, 0, s)),
                pl.BlockSpec((Cout, Cin), lambda s: (0, 0)),
                pl.BlockSpec((Cout, 1), lambda s: (0, 0)),
            ],
            out_specs=pl.BlockSpec((N, Cout, tile_hw), lambda s: (0, 0, s)),
        ),
        compiler_params=pltpu.CompilerParams(
            dimension_semantics=("parallel",),
            vmem_limit_bytes=vmem_limit,
        ),
        cost_estimate=cost,
    )(x, w, bias)


class Conv1x1BN:
    """JAX/Pallas port of conv_1x1_bn."""

    # TODO(synk): BatchNorm2d is implemented in eval mode (running stats folded into a
    # per-channel affine); train-mode batch statistics are not computed.
    def __init__(self, inp, oup, num_parallel, key):
        self.inp, self.oup, self.num_parallel = inp, oup, num_parallel
        self.eps = 1e-5
        k = jax.random.split(key, 6)
        # nn.Linear(1, oup*inp): weight (oup*inp, 1), bias (oup*inp,); fan_in = 1.
        bound = 1.0
        self.fc_w = jax.random.uniform(k[0], (oup * inp, 1), jnp.float32, -bound, bound)
        self.fc_b = jax.random.uniform(k[1], (oup * inp,), jnp.float32, -bound, bound)
        # Per-branch BatchNorm2d(oup) parameters / running stats (deterministic init).
        self.gamma = 1.0 + 0.1 * jax.random.normal(k[2], (num_parallel, oup), jnp.float32)
        self.beta = 0.1 * jax.random.normal(k[3], (num_parallel, oup), jnp.float32)
        self.running_mean = 0.1 * jax.random.normal(k[4], (num_parallel, oup), jnp.float32)
        self.running_var = 1.0 + 0.1 * jax.random.uniform(k[5], (num_parallel, oup), jnp.float32)

    def _folded_params(self, i):
        """BN-folded params for branch i: w' (Cout, Cin), bias (Cout, 1)."""
        scale = 0.7 - 0.1 * i
        # weight_i = fc([scale_i]).reshape(oup, inp, 1, 1) -> keep as (oup, inp)
        w = (self.fc_w[:, 0] * scale + self.fc_b).reshape(self.oup, self.inp)
        a = self.gamma[i] / jnp.sqrt(self.running_var[i] + self.eps)   # (Cout,)
        b = self.beta[i] - self.running_mean[i] * a                    # (Cout,)
        return w * a[:, None], b[:, None]

    def __call__(self, xs):
        # No stacking / unstacking: each branch runs directly on its own buffer.
        outs = []
        for i, x in enumerate(xs):
            N, C, H, W = x.shape
            assert C == self.inp
            w, bias = self._folded_params(i)
            y = conv1x1_bn_relu6(x.reshape(N, C, H * W), w, bias)   # free reshape
            outs.append(y.reshape(N, self.oup, H, W))
        return outs

    def reference(self, xs):
        """Pure-JAX reference computed from the raw (unfolded) parameters."""
        outs = []
        for i in range(self.num_parallel):
            scale_i = 0.7 - 0.1 * i
            w = (self.fc_w[:, 0] * scale_i + self.fc_b).reshape(self.oup, self.inp)
            a = self.gamma[i] / jnp.sqrt(self.running_var[i] + self.eps)
            b = self.beta[i] - self.running_mean[i] * a
            y = jnp.einsum("oc,nchw->nohw", w, xs[i])
            y = y * a[None, :, None, None] + b[None, :, None, None]
            outs.append(jnp.clip(y, 0.0, 6.0))
        return outs


if __name__ == "__main__":
    key = jax.random.PRNGKey(0)
    k_mod, k_x0, k_x1 = jax.random.split(key, 3)

    batch, inp, oup, hw, num_parallel = 2, 4, 8, 16, 2
    module = Conv1x1BN(inp, oup, num_parallel, k_mod)

    xs = [
        jax.random.normal(k_x0, (batch, inp, hw, hw), jnp.float32),
        jax.random.normal(k_x1, (batch, inp, hw, hw), jnp.float32),
    ]

    outs = module(xs)
    outs = [jax.block_until_ready(o) for o in outs]

    refs = module.reference(xs)
    for o, r in zip(outs, refs):
        assert o.shape == (batch, oup, hw, hw)
        assert jnp.allclose(o, r, atol=1e-5, rtol=1e-5)

    print("KERNEL_OK")
</pallas_src>

<mosaic_0001>
module attributes {stable_mosaic.version = 11 : i64} {
  func.func @_conv1x1_bn_relu6_kernel(%arg0: i32, %arg1: memref<2x4x256xf32, #tpu.memory_space<vmem>>, %arg2: memref<8x4xf32, #tpu.memory_space<vmem>>, %arg3: memref<8x1xf32, #tpu.memory_space<vmem>>, %arg4: memref<2x8x256xf32, #tpu.memory_space<vmem>>) attributes {dimension_semantics = [#tpu.dimension_semantics<parallel>], iteration_bounds = array<i64: 1>, scalar_prefetch = 0 : i64, scratch_operands = 0 : i64, tpu.core_type = #tpu.core_type<tc>, window_params = [{transform_indices = @transform_0, window_bounds = array<i64: 2, 4, 256>}, {pipeline_mode = #tpu.pipeline_mode<synchronous>, transform_indices = @transform_1, window_bounds = array<i64: 8, 4>}, {pipeline_mode = #tpu.pipeline_mode<synchronous>, transform_indices = @transform_2, window_bounds = array<i64: 8, 1>}, {transform_indices = @transform_3, window_bounds = array<i64: 2, 8, 256>}]} {
    %c0 = arith.constant 0 : index
    %c0_0 = arith.constant 0 : index
    %0 = vector.load %arg2[%c0, %c0_0] : memref<8x4xf32, #tpu.memory_space<vmem>>, vector<8x4xf32>
    %c0_1 = arith.constant 0 : index
    %c0_2 = arith.constant 0 : index
    %1 = vector.load %arg3[%c0_1, %c0_2] : memref<8x1xf32, #tpu.memory_space<vmem>>, vector<8x1xf32>
    %c0_3 = arith.constant 0 : index
    %c0_4 = arith.constant 0 : index
    %c0_5 = arith.constant 0 : index
    %2 = vector.load %arg1[%c0_3, %c0_4, %c0_5] : memref<2x4x256xf32, #tpu.memory_space<vmem>>, vector<1x4x256xf32>
    %3 = vector.shape_cast %2 : vector<1x4x256xf32> to vector<4x256xf32>
    %cst = arith.constant dense<0.000000e+00> : vector<8x256xf32>
    %4 = tpu.matmul %0, %3, %cst {dimension_numbers = #tpu.dot_dimension_numbers<[1], [0], [0], [1], [0, 0, 1, 1], [], []>} : vector<8x4xf32>, vector<4x256xf32>, vector<8x256xf32> -> vector<8x256xf32>
    %5 = vector.broadcast %1 : vector<8x1xf32> to vector<8x256xf32>
    %6 = arith.addf %4, %5 : vector<8x256xf32>
    %cst_6 = arith.constant 0.000000e+00 : f32
    %7 = vector.broadcast %cst_6 : f32 to vector<8x256xf32>
    %8 = arith.maximumf %6, %7 : vector<8x256xf32>
    %cst_7 = arith.constant 6.000000e+00 : f32
    %9 = vector.broadcast %cst_7 : f32 to vector<8x256xf32>
    %10 = arith.minimumf %8, %9 : vector<8x256xf32>
    %c0_8 = arith.constant 0 : index
    %c0_9 = arith.constant 0 : index
    %c0_10 = arith.constant 0 : index
    %11 = vector.load %arg4[%c0_8, %c0_9, %c0_10] : memref<2x8x256xf32, #tpu.memory_space<vmem>>, vector<1x8x256xf32>
    %12 = vector.shape_cast %11 : vector<1x8x256xf32> to vector<8x256xf32>
    %13 = vector.shape_cast %10 : vector<8x256xf32> to vector<1x8x256xf32>
    tpu.vector_store %arg4[%c0_8, %c0_9, %c0_10], %13 {strides = array<i32>} : memref<2x8x256xf32, #tpu.memory_space<vmem>>, vector<1x8x256xf32>,
    %c1 = arith.constant 1 : index
    %c0_11 = arith.constant 0 : index
    %c0_12 = arith.constant 0 : index
    %14 = vector.load %arg1[%c1, %c0_11, %c0_12] : memref<2x4x256xf32, #tpu.memory_space<vmem>>, vector<1x4x256xf32>
    %15 = vector.shape_cast %14 : vector<1x4x256xf32> to vector<4x256xf32>
    %cst_13 = arith.constant dense<0.000000e+00> : vector<8x256xf32>
    %16 = tpu.matmul %0, %15, %cst_13 {dimension_numbers = #tpu.dot_dimension_numbers<[1], [0], [0], [1], [0, 0, 1, 1], [], []>} : vector<8x4xf32>, vector<4x256xf32>, vector<8x256xf32> -> vector<8x256xf32>
    %17 = vector.broadcast %1 : vector<8x1xf32> to vector<8x256xf32>
    %18 = arith.addf %16, %17 : vector<8x256xf32>
    %cst_14 = arith.constant 0.000000e+00 : f32
    %19 = vector.broadcast %cst_14 : f32 to vector<8x256xf32>
    %20 = arith.maximumf %18, %19 : vector<8x256xf32>
    %cst_15 = arith.constant 6.000000e+00 : f32
    %21 = vector.broadcast %cst_15 : f32 to vector<8x256xf32>
    %22 = arith.minimumf %20, %21 : vector<8x256xf32>
    %c1_16 = arith.constant 1 : index
    %c0_17 = arith.constant 0 : index
    %c0_18 = arith.constant 0 : index
    %23 = vector.load %arg4[%c1_16, %c0_17, %c0_18] : memref<2x8x256xf32, #tpu.memory_space<vmem>>, vector<1x8x256xf32>
    %24 = vector.shape_cast %23 : vector<1x8x256xf32> to vector<8x256xf32>
    %25 = vector.shape_cast %22 : vector<8x256xf32> to vector<1x8x256xf32>
    tpu.vector_store %arg4[%c1_16, %c0_17, %c0_18], %25 {strides = array<i32>} : memref<2x8x256xf32, #tpu.memory_space<vmem>>, vector<1x8x256xf32>,
    return
  }
  func.func @transform_0(%arg0: i32) -> (i32, i32, i32) {
    %c0_i32 = arith.constant 0 : i32
    %c0_i32_0 = arith.constant 0 : i32
    %c0_i32_1 = arith.constant 0 : i32
    return %c0_i32, %c0_i32_0, %arg0 : i32, i32, i32
  }
  func.func @transform_1(%arg0: i32) -> (i32, i32) {
    %c0_i32 = arith.constant 0 : i32
    %c0_i32_0 = arith.constant 0 : i32
    %c0_i32_1 = arith.constant 0 : i32
    return %c0_i32, %c0_i32_0 : i32, i32
  }
  func.func @transform_2(%arg0: i32) -> (i32, i32) {
    %c0_i32 = arith.constant 0 : i32
    %c0_i32_0 = arith.constant 0 : i32
    %c0_i32_1 = arith.constant 0 : i32
    return %c0_i32, %c0_i32_0 : i32, i32
  }
  func.func @transform_3(%arg0: i32) -> (i32, i32, i32) {
    %c0_i32 = arith.constant 0 : i32
    %c0_i32_0 = arith.constant 0 : i32
    %c0_i32_1 = arith.constant 0 : i32
    return %c0_i32, %c0_i32_0, %arg0 : i32, i32, i32
  }
}

</mosaic_0001>

<bundles_post_ra>
// kernel: tpu_custom_call.1
= control target key start
LH: loop header
LB: loop body
LE: loop exit
PB: predicated region body
PF: predicated region fallthrough
CT: control target
= control target key end

     0   :  { %vm29_vm0 = vcmask 1043456   ;;  %v250_v4 = vmov 0.0   ;;  %s294_s0 = inlined_call_operand.vmem [shape: f32[2,4,256], index: 0, kind: input, shape index: {}]   ;;  %s295_s1 = inlined_call_operand.vmem [shape: f32[8,4], index: 1, kind: input, shape index: {}]   ;;  %s296_s2 = inlined_call_operand.vmem [shape: f32[8,1], index: 2, kind: input, shape index: {}]   ;;  %s297_s3 = inlined_call_operand.hbm [shape: f32[2,8,256], index: 3, kind: output, shape index: {}]  }
   0x1   :  { %v17_v0 = vld [vmem:[%s294_s0] sm:$0xff]  ;;  %v216_v1 = vld [vmem:[%s294_s0 + $0x8] sm:$0xff]  ;;  %98 = vmatprep.mubr.f32.mxu0 %v250_v4  ;;  %183 = vmatprep.mubr.f32.mxu1 %v250_v4 }
   0x2   :  { %v24_v2 = vcombine.high %v17_v0, %v17_v0  ;;  %v114_v3 = vcombine.high %v216_v1, %v216_v1 }
   0x3   :  { %8 = vsyncpa [#allocation3], 0  ;;  %v15_v5 = vld [vmem:[%s295_s1] sm:$0xff]  ;;  %vm25_vm1 = vcmask 31744   ;;  %v251_v6 = vmov 0   ;;  %s252_s0 = smov [#allocation2]  }
   0x4   :  { %225 = vset.pattern.permute.xlu0 %v251_v6  ;;  %213 = vmatprep.subr.msk.mxu0 %vm29_vm0, %v24_v2  ;;  %v16_v7 = vld [vmem:[%s296_s2] sm:$0xff]  ;;  %s202_s1 = sshll.u32 %s252_s0, 4  ;;  %s203_s1 = int_to_ptr.vmem [resolvable:$true] %s202_s1 }
   0x5   :  { %217 = vmatprep.subr.msk.mxu1 %vm29_vm0, %v114_v3  ;;  %214 = vmatpush1.msk.msra.mxu0 %vm29_vm0, %v17_v0  ;;  %s228_s2 = scalar_lea.vmem %s203_s1, 512  ;;  %p233_p1 = scmp.lt.s32.totalorder %s203_s1, %s203_s1 }
   0x6   :  { %218 = vmatpush1.msk.msra.mxu1 %vm29_vm0, %v216_v1  ;;  %215 = vmatmul.mubr.msk.f32.vlgmr.msra.gmra.mxu0 %vm25_vm1, %v15_v5  ;;  %p229_p0 = scmp.ne.s32.totalorder %s203_s1, %s228_s2  ;;  %p234_p2 = scmp.lt.s32.totalorder %s228_s2, %s228_s2 }
   0x7   :  { %219 = vmatmul.mubr.msk.f32.vlgmr.msra.gmra.mxu1 %vm25_vm1, %v15_v5  ;;  %20 = vperm.xlu0 %225, %v16_v7  }
   0x8   :  { %p235_p3 = por %p234_p2, %p233_p1 }
   0xa   :  { %p236_p4 = pnand %p235_p3, %p229_p0 }
  0x82   :  { %v21_v8 = vpop.permute.xlu0 %20 }
  0xc6   :  { %v100_v9 = vpop.f32.mrf.mxu0 }
  0xc7   :  { %v185_v10 = vpop.f32.mrf.mxu1  ;;  %v101_v11 = vadd.f32 %v100_v9, %v21_v8 }
  0xc8   :  { %v186_v12 = vadd.f32 %v185_v10, %v21_v8  ;;  %v102_v13 = vpop.f32.mrf.mxu0 }
  0xc9   :  { %v187_v14 = vpop.f32.mrf.mxu1  ;;  %v105_v15 = vmax.f32 %v101_v11, 0.0  ;;  %v103_v17 = vadd.f32 %v102_v13, %v21_v8 }
  0xca   :  { %v190_v16 = vmax.f32 %v186_v12, 0.0  ;;  %v188_v18 = vadd.f32 %v187_v14, %v21_v8 }
  0xcb   :  { %v107_v19 = vmin.f32 %v105_v15, 6.0  ;;  %v106_v21 = vmax.f32 %v103_v17, 0.0 }
  0xcc   :  { %v192_v20 = vmin.f32 %v190_v16, 6.0  ;;  %v191_v22 = vmax.f32 %v188_v18, 0.0 }
  0xcd   :  { %109 = vst [vmem:[#allocation2] sm:$0xff] %v107_v19  ;;  %v108_v23 = vmin.f32 %v106_v21, 6.0 }
  0xce   :  { %195 = vst [vmem:[#allocation2 + $0x10] sm:$0xff] %v192_v20  ;;  %v193_v24 = vmin.f32 %v191_v22, 6.0 }
  0xcf   :  { %110 = vst [vmem:[#allocation2 + $0x8] sm:$0xff] %v108_v23 }
  0xd0   :  { %196 = vst [vmem:[#allocation2 + $0x18] sm:$0xff] %v193_v24 }
  0xd1   :  { %239 = shalt.err (!%p236_p4)
}
  0xd2   :  { %s253_s20 = smov 256   ;;  %s254_s21 = smov 16  }
  0xd3   :  { %208 = dma.vmem_to_hbm [thread:$0]  %s203_s1, 512, %s297_s3, [#allocation3], %s253_s20, %s253_s20, %s254_s21  }
  0xd4   :  { %248 = dma.done.wait [#allocation3], 512  }
  0xd5   :  { %249 = vsyncadd [#allocation3], 4294966784 }
  0xd6   :  { %212 = vsyncpa [#allocation3], 1 }

</bundles_post_ra>
